<compile_context>
chip_gen: v7x
topology: tpu7x:2x2x1
jax: 0.10.0
libtpu: 0.0.40
codegen_flags: <defaults>
</compile_context>

<pallas_src>
import functools

import jax
import jax.numpy as jnp
from jax.experimental import pallas as pl
from jax.experimental.pallas import tpu as pltpu


def _round_up(v, m):
    return (v + m - 1) // m * m


# ---------------------------------------------------------------------------
# shared in-kernel helper
# ---------------------------------------------------------------------------
def _onehot_bt(batch_row, num_graphs):
    """[B, T] boolean one-hot mask built from lane-dense batch ids [1, T]."""
    tile_n = batch_row.shape[1]
    g_ids = jax.lax.broadcasted_iota(jnp.int32, (num_graphs, tile_n), 0)
    return jnp.broadcast_to(batch_row, (num_graphs, tile_n)) == g_ids


# ---------------------------------------------------------------------------
# pass 1: segment-sum pooling, accumulated directly into the [B, H] output
# ---------------------------------------------------------------------------
def _pool_kernel(num_graphs, batch_row_ref, x_ref, sum_ref):
    @pl.when(pl.program_id(0) == 0)
    def _():
        sum_ref[...] = jnp.zeros(sum_ref.shape, sum_ref.dtype)

    onehot = _onehot_bt(batch_row_ref[...], num_graphs).astype(jnp.bfloat16)
    # padded node columns have batch id == num_graphs -> all-zero columns
    sum_ref[...] += jnp.dot(onehot, x_ref[...],
                            preferred_element_type=jnp.float32)          # [B, H]


# ---------------------------------------------------------------------------
# pass 1b: tiny vn_mlp finalize (mean, Linear, BN(eval), ReLU, Linear)
# ---------------------------------------------------------------------------
def _vn_mlp_kernel(vemb_ref, sum_ref, cnt_ref,
                   w1_ref, b1_ref, bn_scale_ref, bn_shift_ref, w2_ref, b2_ref,
                   vn_f32_ref, vn_bf16_ref):
    vn_input = sum_ref[...] / jnp.maximum(cnt_ref[...], 1.0)              # mean pool
    h = vemb_ref[...] + vn_input                                          # [B, H]
    h1 = jnp.dot(h.astype(jnp.bfloat16), w1_ref[...],
                 preferred_element_type=jnp.float32) + b1_ref[...]
    h1 = h1 * bn_scale_ref[...] + bn_shift_ref[...]                       # BN (eval, folded)
    h1 = jnp.maximum(h1, 0.0)                                             # ReLU; dropout = identity
    vn = jnp.dot(h1.astype(jnp.bfloat16), w2_ref[...],
                 preferred_element_type=jnp.float32) + b2_ref[...]
    vn_f32_ref[...] = vn
    vn_bf16_ref[...] = vn.astype(jnp.bfloat16)                            # hoisted cast for gathers


# ---------------------------------------------------------------------------
# pass 2: attention logits (cached, lane-dense) + online (max, sum-exp) stats
# ---------------------------------------------------------------------------
def _attn_stats_kernel(num_graphs, num_valid_nodes, tile_n,
                       batch_row_ref, x_ref, vn_bf16_ref,
                       wa1x_ref, wa1v_ref, ba1_ref, wa2_row_ref, ba2_ref,
                       m_ref, l_ref, logits_ref):
    i = pl.program_id(0)

    @pl.when(i == 0)
    def _():
        m_ref[...] = jnp.full(m_ref.shape, -jnp.inf, m_ref.dtype)
        l_ref[...] = jnp.zeros(l_ref.shape, l_ref.dtype)

    # vn_updated[batch] gather as a one-hot matmul (exact: single 1.0 per row)
    onehot = _onehot_bt(batch_row_ref[...], num_graphs).astype(jnp.bfloat16)
    vn_exp = jax.lax.dot_general(onehot, vn_bf16_ref[...],
                                 dimension_numbers=(((0,), (0,)), ((), ())))  # [T, H] bf16

    # vn_attention(cat([x, vn_expanded])) with the first Linear split in two
    a = (jnp.dot(x_ref[...], wa1x_ref[...], preferred_element_type=jnp.float32)
         + jnp.dot(vn_exp, wa1v_ref[...], preferred_element_type=jnp.float32)
         + ba1_ref[...])
    a = jnp.tanh(a)                                                        # f32 (v5e-safe)

    # second Linear computed directly in the lane-dense [1, T] layout:
    # logits[0, t] = sum_h a[t, h] * wa2[h, 0]
    logits = jax.lax.dot_general(wa2_row_ref[...], a.astype(jnp.bfloat16),
                                 dimension_numbers=(((1,), (1,)), ((), ())),
                                 preferred_element_type=jnp.float32) + ba2_ref[...]

    # mask padded node lanes so they never win the softmax
    lane = i * tile_n + jax.lax.broadcasted_iota(jnp.int32, (1, tile_n), 1)
    logits = jnp.where(lane < num_valid_nodes, logits, -jnp.inf)
    logits_ref[...] = logits                                               # cached for pass 3

    # online softmax statistics over ALL nodes (softmax dim=0)
    m_old = m_ref[...]
    m_new = jnp.maximum(m_old, jnp.max(logits, axis=1, keepdims=True))
    l_ref[...] = (l_ref[...] * jnp.exp(m_old - m_new)
                  + jnp.sum(jnp.exp(logits - m_new), axis=1, keepdims=True))
    m_ref[...] = m_new


# ---------------------------------------------------------------------------
# pass 3: vn_contribution = vn_updated[batch] * softmax weight (bf16 writeback)
# ---------------------------------------------------------------------------
def _contrib_kernel(num_graphs, batch_row_ref, vn_bf16_ref, logits_ref,
                    m_ref, l_ref, contrib_ref):
    onehot = _onehot_bt(batch_row_ref[...], num_graphs)                    # [B, T] bool
    w_row = jnp.exp(logits_ref[...] - m_ref[...]) / l_ref[...]             # [1, T] f32
    # fold the softmax weight into the one-hot so the gather and the scale
    # are one MXU op and no [T, 1] sublane relayout is needed
    weighted = jnp.where(onehot, w_row, 0.0).astype(jnp.bfloat16)          # [B, T]
    contrib_ref[...] = jax.lax.dot_general(
        weighted, vn_bf16_ref[...],
        dimension_numbers=(((0,), (0,)), ((), ())))                        # [T, H] bf16


# ---------------------------------------------------------------------------
# host-side wrapper
# ---------------------------------------------------------------------------
def virtual_node_forward(x, batch, params, num_graphs, max_tile_n=2048):
    N, H = x.shape
    B = int(num_graphs)
    H2 = 2 * H
    f32, bf16 = jnp.float32, jnp.bfloat16

    # --- per-generation VMEM budget -> node tile size ----------------------
    try:
        vmem_cap = int(pltpu.get_tpu_info().vmem_capacity_bytes)
    except Exception:                                   # query unavailable -> be conservative
        vmem_cap = 64 * 1024 * 1024
    vmem_limit = min(vmem_cap * 3 // 4, 96 * 1024 * 1024)   # ~48 MiB on v7x, 96 MiB on v5e/v6e
    # dominant per-node-row VMEM: double-buffered bf16 x / contrib tiles + f32 temps
    per_row = 8 * H + 32
    tile_cap = max(128, (vmem_limit // 4 // per_row) // 128 * 128)
    tile_n = int(min(max_tile_n, tile_cap, _round_up(N, 128)))   # multiple of 128 (lane-dense rows)
    Np = _round_up(N, tile_n)
    nt = Np // tile_n

    # --- inputs (no lane padding of H in HBM) -------------------------------
    x_p = jnp.zeros((Np, H), bf16).at[:N, :].set(x.astype(bf16))
    # lane-dense batch ids; padded nodes get id = B -> match no graph
    batch_row = jnp.full((1, Np), B, jnp.int32).at[0, :N].set(batch.astype(jnp.int32))
    # graph node counts are cheap O(N) scalar work -> plain XLA, not in the hot loop
    counts = jnp.zeros((B,), f32).at[batch].add(1.0).reshape(B, 1)

    # --- parameters (BN folded for eval mode) -------------------------------
    eps = 1e-5
    bn_scale = (params["bn_gamma"] / jnp.sqrt(params["bn_var"] + eps)).reshape(1, H2).astype(f32)
    bn_shift = (params["bn_beta"].reshape(1, H2).astype(f32)
                - params["bn_mean"].reshape(1, H2).astype(f32) * bn_scale)

    vemb = params["virtual_emb"].reshape(1, H).astype(f32)
    w1 = params["w1"].astype(bf16)
    b1 = params["b1"].reshape(1, H2).astype(f32)
    w2 = params["w2"].astype(bf16)
    b2 = params["b2"].reshape(1, H).astype(f32)
    wa1 = params["wa1"]
    wa1x = wa1[:H, :].astype(bf16)                      # x half of the first attention Linear
    wa1v = wa1[H:, :].astype(bf16)                      # vn_expanded half
    ba1 = params["ba1"].reshape(1, H).astype(f32)
    wa2_row = params["wa2"].reshape(1, H).astype(bf16)  # transposed -> lane-dense logits
    ba2 = params["ba2"].reshape(1, 1).astype(f32)

    def const_spec(arr):
        # full-array block, same block every grid step -> fetched once, stays resident
        return pl.BlockSpec(arr.shape, lambda *_: (0,) * arr.ndim)

    cp_seq = pltpu.CompilerParams(dimension_semantics=("arbitrary",),
                                  vmem_limit_bytes=vmem_limit)
    cp_par = pltpu.CompilerParams(dimension_semantics=("parallel",),
                                  vmem_limit_bytes=vmem_limit)
    # TODO(synk): on v7x the two sequential reduction passes could additionally be
    # split across the 2 TensorCores with per-core partial (sum)/(m,l) outputs.

    # ---- pass 1: segment-sum pool over node tiles -> pooled_sum [B, H] ----
    pooled_sum = pl.pallas_call(
        functools.partial(_pool_kernel, B),
        out_shape=jax.ShapeDtypeStruct((B, H), f32),
        grid=(nt,),
        in_specs=[pl.BlockSpec((1, tile_n), lambda i: (0, i)),      # batch ids (lanes = nodes)
                  pl.BlockSpec((tile_n, H), lambda i: (i, 0))],     # x tile
        out_specs=pl.BlockSpec((B, H), lambda i: (0, 0)),
        compiler_params=cp_seq,
    )(batch_row, x_p)

    # ---- pass 1b: tiny vn_mlp finalize -> vn_updated (f32 + bf16 copy) ----
    mlp_args = (vemb, pooled_sum, counts, w1, b1, bn_scale, bn_shift, w2, b2)
    vn_updated, vn_bf16 = pl.pallas_call(
        _vn_mlp_kernel,
        out_shape=(jax.ShapeDtypeStruct((B, H), f32),
                   jax.ShapeDtypeStruct((B, H), bf16)),
        grid=(1,),
        in_specs=[const_spec(a) for a in mlp_args],
        out_specs=(pl.BlockSpec((B, H), lambda i: (0, 0)),
                   pl.BlockSpec((B, H), lambda i: (0, 0))),
        compiler_params=cp_seq,
    )(*mlp_args)

    # ---- pass 2: attention logits (cached lane-dense) + softmax stats ----
    m_arr, l_arr, logits = pl.pallas_call(
        functools.partial(_attn_stats_kernel, B, N, tile_n),
        out_shape=(jax.ShapeDtypeStruct((1, 1), f32),
                   jax.ShapeDtypeStruct((1, 1), f32),
                   jax.ShapeDtypeStruct((1, Np), f32)),
        grid=(nt,),
        in_specs=[pl.BlockSpec((1, tile_n), lambda i: (0, i)),      # batch ids
                  pl.BlockSpec((tile_n, H), lambda i: (i, 0)),      # x tile
                  const_spec(vn_bf16),
                  const_spec(wa1x), const_spec(wa1v), const_spec(ba1),
                  const_spec(wa2_row), const_spec(ba2)],
        out_specs=(pl.BlockSpec((1, 1), lambda i: (0, 0)),
                   pl.BlockSpec((1, 1), lambda i: (0, 0)),
                   pl.BlockSpec((1, tile_n), lambda i: (0, i))),
        compiler_params=cp_seq,
    )(batch_row, x_p, vn_bf16, wa1x, wa1v, ba1, wa2_row, ba2)

    # ---- pass 3: vn_contribution = vn_updated[batch] * softmax(logits, dim=0) ----
    contrib = pl.pallas_call(
        functools.partial(_contrib_kernel, B),
        out_shape=jax.ShapeDtypeStruct((Np, H), bf16),
        grid=(nt,),
        in_specs=[pl.BlockSpec((1, tile_n), lambda i: (0, i)),      # batch ids
                  const_spec(vn_bf16),
                  pl.BlockSpec((1, tile_n), lambda i: (0, i)),      # cached logits
                  const_spec(m_arr), const_spec(l_arr)],
        out_specs=pl.BlockSpec((tile_n, H), lambda i: (i, 0)),
        compiler_params=cp_par,
    )(batch_row, vn_bf16, logits, m_arr, l_arr)

    # vn_contribution returned in bf16 (halved writeback); vn_updated in f32
    return contrib[:N, :], vn_updated


# ---------------------------------------------------------------------------
# parameters & pure-JAX reference (f32) for a sanity check
# ---------------------------------------------------------------------------
def init_params(key, H):
    ks = jax.random.split(key, 8)
    scale = 1.0 / jnp.sqrt(H)
    return {
        "virtual_emb": jax.random.normal(ks[0], (1, H), jnp.float32),
        "w1": jax.random.normal(ks[1], (H, 2 * H), jnp.float32) * scale,
        "b1": jnp.full((2 * H,), 0.01, jnp.float32),
        "bn_gamma": jnp.linspace(0.9, 1.1, 2 * H, dtype=jnp.float32),
        "bn_beta": jnp.linspace(-0.05, 0.05, 2 * H, dtype=jnp.float32),
        "bn_mean": jnp.zeros((2 * H,), jnp.float32),
        "bn_var": jnp.ones((2 * H,), jnp.float32),
        "w2": jax.random.normal(ks[2], (2 * H, H), jnp.float32) * scale,
        "b2": jnp.full((H,), -0.01, jnp.float32),
        "wa1": jax.random.normal(ks[3], (2 * H, H), jnp.float32) * scale,
        "ba1": jnp.zeros((H,), jnp.float32),
        "wa2": jax.random.normal(ks[4], (H, 1), jnp.float32) * scale,
        "ba2": jnp.zeros((1,), jnp.float32),
    }
    # TODO(synk): node_mlp exists in __init__ but is unused in forward; not instantiated here.


def virtual_node_reference(x, batch, params, num_graphs):
    B = int(num_graphs)
    onehot = (batch[None, :] == jnp.arange(B)[:, None]).astype(jnp.float32)
    counts = jnp.maximum(onehot.sum(1, keepdims=True), 1.0)
    vn_input = onehot @ x / counts
    h = params["virtual_emb"] + vn_input
    eps = 1e-5
    scale = params["bn_gamma"] / jnp.sqrt(params["bn_var"] + eps)
    shift = params["bn_beta"] - params["bn_mean"] * scale
    h1 = jnp.maximum((h @ params["w1"] + params["b1"]) * scale + shift, 0.0)
    vn_updated = h1 @ params["w2"] + params["b2"]
    vn_exp = vn_updated[batch]
    a = jnp.tanh(jnp.concatenate([x, vn_exp], -1) @ params["wa1"] + params["ba1"])
    logits = a @ params["wa2"] + params["ba2"]
    w = jax.nn.softmax(logits, axis=0)
    return vn_exp * w, vn_updated


if __name__ == "__main__":
    key = jax.random.PRNGKey(0)
    H = 32        # hidden_dim
    N = 8         # total number of nodes across all graphs
    B = 2         # number of graphs (batch.max() + 1)

    kx, kp = jax.random.split(key)
    x = jax.random.normal(kx, (N, H), jnp.float32)
    batch = jnp.array([0, 0, 0, 0, 1, 1, 1, 1], dtype=jnp.int32)
    params = init_params(kp, H)

    vn_contribution, vn_updated = virtual_node_forward(x, batch, params, num_graphs=B)
    jax.block_until_ready((vn_contribution, vn_updated))

    assert vn_contribution.shape == (N, H)
    assert vn_updated.shape == (B, H)

    # loose sanity check vs f32 reference (kernel matmuls in bf16, contrib output bf16)
    ref_contrib, ref_vn = virtual_node_reference(x, batch, params, B)
    assert jnp.allclose(vn_updated, ref_vn, rtol=1e-1, atol=1e-1)
    assert jnp.allclose(vn_contribution.astype(jnp.float32), ref_contrib, rtol=1e-1, atol=1e-1)

    print("KERNEL_OK")
</pallas_src>

<mosaic_0001>
module attributes {stable_mosaic.version = 11 : i64} {
  func.func @_pool_kernel(%arg0: i32, %arg1: memref<1x128xi32, #tpu.memory_space<vmem>>, %arg2: memref<128x32xbf16, #tpu.memory_space<vmem>>, %arg3: memref<2x32xf32, #tpu.memory_space<vmem>>) attributes {dimension_semantics = [#tpu.dimension_semantics<arbitrary>], iteration_bounds = array<i64: 1>, scalar_prefetch = 0 : i64, scratch_operands = 0 : i64, tpu.core_type = #tpu.core_type<tc>, window_params = [{transform_indices = @transform_0, window_bounds = array<i64: 1, 128>}, {transform_indices = @transform_1, window_bounds = array<i64: 128, 32>}, {pipeline_mode = #tpu.pipeline_mode<synchronous>, transform_indices = @transform_2, window_bounds = array<i64: 2, 32>}]} {
    %c0_i32 = arith.constant 0 : i32
    %0 = arith.cmpi eq, %arg0, %c0_i32 : i32
    %1 = arith.extui %0 : i1 to i32
    %c0_i32_0 = arith.constant 0 : i32
    %2 = arith.cmpi ne, %1, %c0_i32_0 : i32
    scf.if %2 {
      %cst_8 = arith.constant 0.000000e+00 : f32
      %16 = vector.broadcast %cst_8 : f32 to vector<2x32xf32>
      %c0_9 = arith.constant 0 : index
      %c0_10 = arith.constant 0 : index
      %17 = vector.load %arg3[%c0_9, %c0_10] : memref<2x32xf32, #tpu.memory_space<vmem>>, vector<2x32xf32>
      tpu.vector_store %arg3[%c0_9, %c0_10], %16 {strides = array<i32>} : memref<2x32xf32, #tpu.memory_space<vmem>>, vector<2x32xf32>,
    } else {
    }
    %c0 = arith.constant 0 : index
    %c0_1 = arith.constant 0 : index
    %3 = vector.load %arg1[%c0, %c0_1] : memref<1x128xi32, #tpu.memory_space<vmem>>, vector<1x128xi32>
    %4 = tpu.iota {dimensions = array<i32: 0>} : vector<2x128xi32>
    %5 = vector.shape_cast %3 : vector<1x128xi32> to vector<1x128xi32>
    %6 = vector.broadcast %5 : vector<1x128xi32> to vector<2x128xi32>
    %7 = arith.cmpi eq, %6, %4 : vector<2x128xi32>
    %8 = arith.extui %7 : vector<2x128xi1> to vector<2x128xi32>
    %9 = arith.sitofp %8 : vector<2x128xi32> to vector<2x128xf32>
    %10 = arith.truncf %9 : vector<2x128xf32> to vector<2x128xbf16>
    %c0_2 = arith.constant 0 : index
    %c0_3 = arith.constant 0 : index
    %11 = vector.load %arg3[%c0_2, %c0_3] : memref<2x32xf32, #tpu.memory_space<vmem>>, vector<2x32xf32>
    %c0_4 = arith.constant 0 : index
    %c0_5 = arith.constant 0 : index
    %12 = vector.load %arg2[%c0_4, %c0_5] : memref<128x32xbf16, #tpu.memory_space<vmem>>, vector<128x32xbf16>
    %cst = arith.constant dense<0.000000e+00> : vector<2x32xf32>
    %13 = tpu.matmul %10, %12, %cst {dimension_numbers = #tpu.dot_dimension_numbers<[1], [0], [0], [1], [0, 0, 1, 1], [], []>} : vector<2x128xbf16>, vector<128x32xbf16>, vector<2x32xf32> -> vector<2x32xf32>
    %14 = arith.addf %11, %13 : vector<2x32xf32>
    %c0_6 = arith.constant 0 : index
    %c0_7 = arith.constant 0 : index
    %15 = vector.load %arg3[%c0_6, %c0_7] : memref<2x32xf32, #tpu.memory_space<vmem>>, vector<2x32xf32>
    tpu.vector_store %arg3[%c0_6, %c0_7], %14 {strides = array<i32>} : memref<2x32xf32, #tpu.memory_space<vmem>>, vector<2x32xf32>,
    return
  }
  func.func @transform_0(%arg0: i32) -> (i32, i32) {
    %c0_i32 = arith.constant 0 : i32
    %c0_i32_0 = arith.constant 0 : i32
    return %c0_i32, %arg0 : i32, i32
  }
  func.func @transform_1(%arg0: i32) -> (i32, i32) {
    %c0_i32 = arith.constant 0 : i32
    %c0_i32_0 = arith.constant 0 : i32
    return %arg0, %c0_i32 : i32, i32
  }
  func.func @transform_2(%arg0: i32) -> (i32, i32) {
    %c0_i32 = arith.constant 0 : i32
    %c0_i32_0 = arith.constant 0 : i32
    %c0_i32_1 = arith.constant 0 : i32
    return %c0_i32, %c0_i32_0 : i32, i32
  }
}

</mosaic_0001>

<bundles_post_ra>
// kernel: tpu_custom_call.1
= control target key start
LH: loop header
LB: loop body
LE: loop exit
PB: predicated region body
PF: predicated region fallthrough
CT: control target
= control target key end

     0   :  { %v229_v1 = vmov 0.0   ;;  %vm230_vm0 = vmmov 0   ;;  %vm17_vm1 = vcmask 254976   ;;  %s289_s0 = inlined_call_operand.vmem [shape: s32[1,128], index: 0, kind: input, shape index: {}]   ;;  %s290_s1 = inlined_call_operand.vmem [shape: bf16[128,32], index: 1, kind: input, shape index: {}]   ;;  %s291_s2 = inlined_call_operand.hbm [shape: f32[2,32], index: 2, kind: output, shape index: {}]  }
   0x1   :  { %v197_v0 = vld [vmem:[%s290_s1] sm:$0xff]   ;;  %173 = vmatprep.subr.bf16.mxu0 %v229_v1  ;;  %v198_v2 = vld [vmem:[%s290_s1 + $0x8] sm:$0xff]   ;;  %189 = vmatprep.mubr.msk.bf16.mxu0 %vm230_vm0, %v229_v1  ;;  %18 = vst.msk [vmem:[#allocation2] sm:$0x3] %vm17_vm1, %v229_v1  ;;  %v199_v3 = vld [vmem:[%s290_s1 + $0x10] sm:$0xff]  }
   0x2   :  { %174 = vmatpush3.bf16.msra.mxu0 %v197_v0 }
   0x3   :  { %175 = vmatprep.subr.bf16.mxu0 %v229_v1 }
   0x6   :  { %176 = vmatpush3.bf16.msra.mxu0 %v198_v2 }
   0x7   :  { %177 = vmatprep.subr.bf16.mxu0 %v229_v1 }
   0x8   :  { %7 = vsyncpa [#allocation3], 0  ;;  %v200_v4 = vld [vmem:[%s290_s1 + $0x18] sm:$0xff]   ;;  %v201_v5 = vld [vmem:[%s290_s1 + $0x20] sm:$0xff]   ;;  %v20_v7 = vlaneseq  ;;  %v231_v12 = vmov 1.0|1.0  }
   0x9   :  { %v202_v6 = vld [vmem:[%s290_s1 + $0x28] sm:$0xff]   ;;  %v203_v8 = vld [vmem:[%s290_s1 + $0x30] sm:$0xff]   ;;  %v152_v10 = vld [vmem:[%s289_s0] ss:$0 sm:$0xff]  ;;  %s232_s27 = smov [#allocation2]  }
   0xa   :  { %178 = vmatpush3.bf16.msra.mxu0 %v199_v3  ;;  %v21_v9 = vshrl.u32 %v20_v7, 7  ;;  %v204_v11 = vld [vmem:[%s290_s1 + $0x38] sm:$0xff]   ;;  %v30_v13 = vld [vmem:[#allocation2] sm:$0x3]  ;;  %s144_s28 = sshll.u32 %s232_s27, 4  ;;  %s145_s28 = int_to_ptr.vmem [resolvable:$true] %s144_s28 }
   0xb   :  { %179 = vmatprep.subr.bf16.mxu0 %v229_v1  ;;  %s205_s0 = scalar_lea.vmem %s145_s28, 32  ;;  %p210_p1 = scmp.lt.s32.totalorder %s145_s28, %s145_s28 }
   0xc   :  { %vm26_vm2 = vcmp.eq.s32.totalorder %v152_v10, %v21_v9  ;;  %p206_p0 = scmp.ne.s32.totalorder %s145_s28, %s205_s0  ;;  %p211_p2 = scmp.lt.s32.totalorder %s205_s0, %s205_s0 }
   0xd   :  { %vm162_vm3 = vmpackc.low %vm26_vm2, %vm26_vm2 }
   0xe   :  { %180 = vmatpush3.bf16.msra.mxu0 %v200_v4  ;;  %p212_p3 = por %p211_p2, %p210_p1 }
   0xf   :  { %181 = vmatprep.subr.bf16.mxu0 %v229_v1 }
  0x10   :  { %p213_p4 = pnand %p212_p3, %p206_p0 }
  0x12   :  { %182 = vmatpush3.bf16.msra.mxu0 %v201_v5 }
  0x13   :  { %183 = vmatprep.subr.bf16.mxu0 %v229_v1 }
  0x16   :  { %184 = vmatpush3.bf16.msra.mxu0 %v202_v6 }
  0x17   :  { %185 = vmatprep.subr.bf16.mxu0 %v229_v1 }
  0x1a   :  { %186 = vmatpush3.bf16.msra.mxu0 %v203_v8 }
  0x1b   :  { %187 = vmatprep.subr.bf16.mxu0 %v229_v1 }
  0x1e   :  { %188 = vmatpush3.bf16.msra.mxu0 %v204_v11 }
  0x21   :  { %190 = vmatmul.mubr.msk.bf16.vlgmr.msra.gmra.mrb[0].mxu0 %vm162_vm3, %v231_v12 }
  0xf4   :  { %v129_v14 = vpop.f32.mrb[0].mxu0 }
  0xf5   :  { %v135_v15 = vadd.f32 %v129_v14, %v30_v13  ;;  %v191_v16 = vpop.f32.mrb[1].mxu0 }
  0xf6   :  { %v132_v17 = vpop.f32.mrb[2].mxu0 }
  0xf7   :  { %137 = vst.msk [vmem:[#allocation2] sm:$0x3] %vm17_vm1, %v135_v15  ;;  %v192_v18 = vpop.f32.mrb[3].mxu0 }
  0xf8   :  { %216 = shalt.err (!%p213_p4)
}
  0xf9   :  { %s217_s30 = scalar_lea.hbm %s291_s2, 32 }
  0xfa   :  { %p218_p5 = scmp.ne.s32.totalorder %s291_s2, %s217_s30  ;;  %p221_p6 = scmp.lt.u32.totalorder %s217_s30, %s291_s2 }
  0xfc   :  { %p223_p7 = pnand %p221_p6, %p218_p5 }
  0xfe   :  { %226 = shalt.err (!%p223_p7)
}
  0xff   :  { %147 = dma.vmem_to_hbm [thread:$0]  %s145_s28, 32, %s291_s2, [#allocation3]  }
 0x100   :  { %227 = dma.done.wait [#allocation3], 32  }
 0x101   :  { %228 = vsyncadd [#allocation3], 4294967264 }
 0x102   :  { %151 = vsyncpa [#allocation3], 1 }

</bundles_post_ra>
